<compile_context>
chip_gen: v6e
topology: v6e:2x2x1
jax: 0.10.0
libtpu: 0.0.40
codegen_flags: <defaults>
</compile_context>

<pallas_src>
import math

import jax
import jax.numpy as jnp
from jax.experimental import pallas as pl
from jax.experimental.pallas import tpu as pltpu

_LANE = 128


def make_positional_encoding(outfea: int, max_len: int = 12) -> jax.Array:
    """Build the PE table, shape (max_len, outfea), float32 (like the torch buffer)."""
    assert outfea % 2 == 0, "PositionalEncoding requires an even outfea (same as the PyTorch module)"
    position = jnp.arange(max_len, dtype=jnp.float32)[:, None]                 # (T, 1)
    div_term = jnp.exp(
        jnp.arange(0, outfea, 2, dtype=jnp.float32) * -(math.log(10000.0) / outfea)
    )                                                                          # (F//2,)
    ang = position * div_term                                                  # (T, F//2)
    # interleave: even cols = sin, odd cols = cos  (matches pe[:,0::2]/pe[:,1::2])
    pe = jnp.stack([jnp.sin(ang), jnp.cos(ang)], axis=-1).reshape(max_len, outfea)
    return pe.astype(jnp.float32)


def _pe_add_kernel(x_ref, pe_ref, o_ref):
    # x_ref: (TB, T, NFp)  -- TB batch elements, lane-dense last dim
    # pe_ref: (1, T, NFp)  -- fp32, VMEM-resident (constant index_map)
    # add in fp32 to match the PyTorch fp32 pe buffer, cast back to out dtype
    o_ref[...] = (x_ref[...].astype(jnp.float32) + pe_ref[...]).astype(o_ref.dtype)


def _choose_tile_b(B: int, bytes_per_batch: int, budget_bytes: int = 2 * 1024 * 1024) -> int:
    """Largest divisor of B whose tile fits in ~budget, keeping >=2 grid steps when possible."""
    tb = max(1, min(B, budget_bytes // max(1, bytes_per_batch)))
    if B >= 2:
        tb = max(1, min(tb, B // 2))   # at least 2 grid steps for pipelining / megacore
    while B % tb:
        tb -= 1
    return tb


def positional_encoding_forward(x: jax.Array, pe: jax.Array, *, alias_input: bool = False) -> jax.Array:
    """x: (B, T, N, F), pe: (T, F)  ->  x + pe (broadcast over B and N)."""
    B, T, N, F = x.shape
    assert pe.shape == (T, F), f"pe shape {pe.shape} incompatible with x {x.shape}"

    NF = N * F
    # Pre-tile pe across nodes once (wrapper-side, XLA) -> lane-dense (T, N*F) slab.
    pe_tiled = jnp.tile(pe.astype(jnp.float32)[:, None, :], (1, N, 1)).reshape(T, NF)
    x2 = x.reshape(B, T, NF)

    # Pad last dim to a multiple of 128 lanes so stores are full-lane.
    pad = (-NF) % _LANE
    NFp = NF + pad
    if pad:
        x2 = jnp.pad(x2, ((0, 0), (0, 0), (0, pad)))
        pe_tiled = jnp.pad(pe_tiled, ((0, 0), (0, pad)))
    pe_tiled = pe_tiled[None]  # (1, T, NFp)

    tb = _choose_tile_b(B, T * NFp * x.dtype.itemsize)
    grid = (B // tb,)

    out = pl.pallas_call(
        _pe_add_kernel,
        out_shape=jax.ShapeDtypeStruct((B, T, NFp), x.dtype),
        grid_spec=pltpu.PrefetchScalarGridSpec(
            num_scalar_prefetch=0,
            grid=grid,
            in_specs=[
                pl.BlockSpec((tb, T, NFp), lambda i: (i, 0, 0)),
                # constant index_map -> fetched once, stays VMEM-resident
                pl.BlockSpec((1, T, NFp), lambda i: (0, 0, 0)),
            ],
            out_specs=pl.BlockSpec((tb, T, NFp), lambda i: (i, 0, 0)),
        ),
        compiler_params=pltpu.CompilerParams(
            dimension_semantics=("parallel",),
        ),
        # Opt-in only: safe when the caller does not need x after this op.
        input_output_aliases={0: 0} if alias_input else {},
    )(x2, pe_tiled)

    if pad:
        out = out[..., :NF]
    return out.reshape(B, T, N, F)


if __name__ == "__main__":
    # small shapes consistent with the module: outfea=32, max_len=12
    B, T, N, F = 2, 12, 16, 32

    key = jax.random.PRNGKey(0)
    x = jax.random.normal(key, (B, T, N, F), dtype=jnp.float32)

    pe = make_positional_encoding(outfea=F, max_len=T)

    out = jax.block_until_ready(positional_encoding_forward(x, pe))

    # sanity check against plain-JAX reference (broadcast add)
    ref = x + pe[None, :, None, :]
    assert out.shape == (B, T, N, F)
    assert jnp.allclose(out, ref, atol=1e-6), "mismatch vs reference"

    print("KERNEL_OK")
</pallas_src>

<mosaic_0001>
module attributes {stable_mosaic.version = 11 : i64} {
  func.func @_pe_add_kernel(%arg0: i32, %arg1: memref<1x12x512xf32, #tpu.memory_space<vmem>>, %arg2: memref<1x12x512xf32, #tpu.memory_space<vmem>>, %arg3: memref<1x12x512xf32, #tpu.memory_space<vmem>>) attributes {dimension_semantics = [#tpu.dimension_semantics<parallel>], iteration_bounds = array<i64: 2>, scalar_prefetch = 0 : i64, scratch_operands = 0 : i64, tpu.core_type = #tpu.core_type<tc>, window_params = [{transform_indices = @transform_0, window_bounds = array<i64: 1, 12, 512>}, {pipeline_mode = #tpu.pipeline_mode<synchronous>, transform_indices = @transform_1, window_bounds = array<i64: 1, 12, 512>}, {transform_indices = @transform_2, window_bounds = array<i64: 1, 12, 512>}]} {
    %c0 = arith.constant 0 : index
    %c0_0 = arith.constant 0 : index
    %c0_1 = arith.constant 0 : index
    %0 = vector.load %arg1[%c0, %c0_0, %c0_1] : memref<1x12x512xf32, #tpu.memory_space<vmem>>, vector<1x12x512xf32>
    %c0_2 = arith.constant 0 : index
    %c0_3 = arith.constant 0 : index
    %c0_4 = arith.constant 0 : index
    %1 = vector.load %arg2[%c0_2, %c0_3, %c0_4] : memref<1x12x512xf32, #tpu.memory_space<vmem>>, vector<1x12x512xf32>
    %2 = arith.addf %0, %1 : vector<1x12x512xf32>
    %c0_5 = arith.constant 0 : index
    %c0_6 = arith.constant 0 : index
    %c0_7 = arith.constant 0 : index
    %3 = vector.load %arg3[%c0_5, %c0_6, %c0_7] : memref<1x12x512xf32, #tpu.memory_space<vmem>>, vector<1x12x512xf32>
    tpu.vector_store %arg3[%c0_5, %c0_6, %c0_7], %2 {strides = array<i32>} : memref<1x12x512xf32, #tpu.memory_space<vmem>>, vector<1x12x512xf32>,
    return
  }
  func.func @transform_0(%arg0: i32) -> (i32, i32, i32) {
    %c0_i32 = arith.constant 0 : i32
    %c0_i32_0 = arith.constant 0 : i32
    %c0_i32_1 = arith.constant 0 : i32
    return %arg0, %c0_i32, %c0_i32_0 : i32, i32, i32
  }
  func.func @transform_1(%arg0: i32) -> (i32, i32, i32) {
    %c0_i32 = arith.constant 0 : i32
    %c0_i32_0 = arith.constant 0 : i32
    %c0_i32_1 = arith.constant 0 : i32
    %c0_i32_2 = arith.constant 0 : i32
    return %c0_i32, %c0_i32_0, %c0_i32_1 : i32, i32, i32
  }
  func.func @transform_2(%arg0: i32) -> (i32, i32, i32) {
    %c0_i32 = arith.constant 0 : i32
    %c0_i32_0 = arith.constant 0 : i32
    %c0_i32_1 = arith.constant 0 : i32
    return %arg0, %c0_i32, %c0_i32_0 : i32, i32, i32
  }
}

</mosaic_0001>

<bundles_post_ra>
// kernel: tpu_custom_call.1
= control target key start
LH: loop header
LB: loop body
LE: loop exit
PB: predicated region body
PF: predicated region fallthrough
CT: control target
= control target key end

     0   :  { %s275_s9 = smov 0   ;;  %s316_s0 = inlined_call_operand.vmem [shape: f32[2,12,512], index: 0, kind: input, shape index: {}]   ;;  %s317_s1 = inlined_call_operand.vmem [shape: f32[1,12,512], index: 1, kind: input, shape index: {}]   ;;  %s318_s2 = inlined_call_operand.vmem [shape: f32[2,12,512], index: 2, kind: output, shape index: {}]  }
   0x1 LB: > { %s231_s10 = sadd.s32 4294967295, %s258_s9   ;;  %p235_p0 = scmp.ge.s32.totalorder %s258_s9, 1  ;;  %s258_s9 = sphi %s275_s9, %s12_s9  }
   0x2   : > { %p112_p1 = scmp.lt.s32.totalorder %s258_s9, 3 }
   0x4   : > { %p113_p2 = pnand %p235_p0, %p112_p1 }
   0x5   : > { %p134_p3 = scmp.lt.s32.totalorder (!%p113_p2), %s231_s10, 1 }
   0x6   : > { %116 = sbr.rel (%p113_p2) target bundleno = 21 (0x15), region = 28 }
   0xb   : > { %s320_s10 = smov (!%p134_p3, %s231_s10), 1  ;;  %v152_v0 = vld [vmem:[%s317_s1] sm:$0xff]  ;;  %v153_v1 = vld [vmem:[%s317_s1 + $0x8] sm:$0xff]  ;;  %v154_v2 = vld [vmem:[%s317_s1 + $0x10] sm:$0xff] }
   0xc   : > { %s242_s15 = sshll.u32 %s320_s10, 6  ;;  %v155_v3 = vld [vmem:[%s317_s1 + $0x18] sm:$0xff]  ;;  %v156_v4 = vld [vmem:[%s317_s1 + $0x20] sm:$0xf]  ;;  %v157_v5 = vld [vmem:[%s317_s1 + $0x28] sm:$0xf] }
   0xd   : > { %s138_s24 = scalar_lea.vmem %s316_s0, %s242_s15  ;;  %v158_v6 = vld [vmem:[%s317_s1 + $0x30] sm:$0xf]  ;;  %v159_v7 = vld [vmem:[%s317_s1 + $0x38] sm:$0xf]  ;;  %s143_s5 = scalar_lea.vmem %s318_s2, %s242_s15 }
   0xe   : > { %v144_v8 = vld [vmem:[%s138_s24] sm:$0xff]  ;;  %v145_v9 = vld [vmem:[%s138_s24 + $0x8] sm:$0xff]  ;;  %v146_v10 = vld [vmem:[%s138_s24 + $0x10] sm:$0xff] }
   0xf   : > { %v160_v11 = vadd.f32 %v152_v0, %v144_v8  ;;  %v161_v12 = vadd.f32 %v153_v1, %v145_v9  ;;  %v162_v13 = vadd.f32 %v154_v2, %v146_v10  ;;  %v147_v14 = vld [vmem:[%s138_s24 + $0x18] sm:$0xff]  ;;  %v148_v15 = vld [vmem:[%s138_s24 + $0x20] sm:$0xf]  ;;  %v149_v16 = vld [vmem:[%s138_s24 + $0x28] sm:$0xf] }
  0x10   : > { %v163_v17 = vadd.f32 %v155_v3, %v147_v14  ;;  %v164_v18 = vadd.f32 %v156_v4, %v148_v15  ;;  %v165_v19 = vadd.f32 %v157_v5, %v149_v16  ;;  %v150_v20 = vld [vmem:[%s138_s24 + $0x30] sm:$0xf]  ;;  %v151_v21 = vld [vmem:[%s138_s24 + $0x38] sm:$0xf] }
  0x11   : > { %168 = vst [vmem:[%s143_s5] sm:$0xff] %v160_v11  ;;  %169 = vst [vmem:[%s143_s5 + $0x8] sm:$0xff] %v161_v12  ;;  %v166_v22 = vadd.f32 %v158_v6, %v150_v20  ;;  %v167_v23 = vadd.f32 %v159_v7, %v151_v21 }
  0x12   : > { %170 = vst [vmem:[%s143_s5 + $0x10] sm:$0xff] %v162_v13  ;;  %171 = vst [vmem:[%s143_s5 + $0x18] sm:$0xff] %v163_v17 }
  0x13   : > { %172 = vst [vmem:[%s143_s5 + $0x20] sm:$0xf] %v164_v18  ;;  %173 = vst [vmem:[%s143_s5 + $0x28] sm:$0xf] %v165_v19 }
  0x14   : > { %174 = vst [vmem:[%s143_s5 + $0x30] sm:$0xf] %v166_v22  ;;  %175 = vst [vmem:[%s143_s5 + $0x38] sm:$0xf] %v167_v23 }
  0x15 PF: > { %s12_s9 = sadd.s32 1, %s258_s9  }
  0x16   : > { %p9_p4 = scmp.ge.s32.totalorder %s12_s9, 4  }
  0x18   :  { %11 = sbr.rel (!%p9_p4) target bundleno = 1 (0x1), region = 58 }

</bundles_post_ra>
